<compile_context>
chip_gen: v7x
topology: tpu7x:2x2x1
jax: 0.10.0
libtpu: 0.0.40
codegen_flags: <defaults>
</compile_context>

<pallas_src>
import functools

import jax
import jax.numpy as jnp
from jax.experimental import pallas as pl
from jax.experimental.pallas import tpu as pltpu

_EPS = 1e-5


def _fused_kernel(x_ref, w1_ref, w2_ref, bnp_ref, mask_ref, o_ref,
                  y1_ref, y2_ref, *, N, H, W, PC):
    """Whole residual block, all images resident in VMEM.

    x_ref   : (N, PC, HW)  input, channel-plane layout (pixels on lanes)
    w*_ref  : (PC, 9*PC)   tap-major (ky,kx) then c_in weight slabs
    bnp_ref : (PC, 4)      columns [gamma1, beta1, gamma2, beta2]
    mask_ref: (9*PC, HW)   boundary-validity masks, replicated over channels
    o_ref   : (N, PC, HW)  output
    y1_ref / y2_ref : VMEM scratch (N, PC, HW) f32
    """
    HW = H * W
    w1 = w1_ref[...]
    w2 = w2_ref[...]
    mask = mask_ref[...]
    inv_count = 1.0 / (N * HW)

    # Static tap shifts: tap (ky,kx) needs shifted[:, p] == x[:, p + d] with
    # d = (ky-1)*W + (kx-1); pltpu.roll follows jnp.roll semantics, so the
    # required (non-negative) rotate amount is (-d) mod HW.
    shifts = []
    for ky in range(3):
        for kx in range(3):
            d = (ky - 1) * W + (kx - 1)
            shifts.append((-d) % HW)

    def conv3x3(xin, wcol):
        # xin: (PC, HW) f32 -> (PC, HW) f32 via a single MXU matmul.
        taps = [xin if s == 0 else pltpu.roll(xin, shift=s, axis=1)
                for s in shifts]
        patch = jnp.concatenate(taps, axis=0) * mask        # (9*PC, HW)
        return jnp.dot(wcol, patch, preferred_element_type=jnp.float32)

    def bn_affine(s1, s2, gamma, beta):
        mean = s1 * inv_count
        var = s2 * inv_count - mean * mean
        scale = gamma * jax.lax.rsqrt(var + _EPS)
        return scale, beta - mean * scale                    # (PC,1) each

    # ---- pass 1: conv1 + BN1 batch statistics --------------------------------
    s1 = jnp.zeros((PC, 1), jnp.float32)
    s2 = jnp.zeros((PC, 1), jnp.float32)
    for n in range(N):
        y = conv3x3(x_ref[n].astype(jnp.float32), w1)
        y1_ref[n] = y
        s1 = s1 + jnp.sum(y, axis=1, keepdims=True)
        s2 = s2 + jnp.sum(y * y, axis=1, keepdims=True)
    scale1, shift1 = bn_affine(s1, s2, bnp_ref[:, 0:1], bnp_ref[:, 1:2])

    # ---- pass 2: BN1 + ReLU + conv2 + BN2 batch statistics -------------------
    s1 = jnp.zeros((PC, 1), jnp.float32)
    s2 = jnp.zeros((PC, 1), jnp.float32)
    for n in range(N):
        a = jnp.maximum(y1_ref[n] * scale1 + shift1, 0.0)
        y = conv3x3(a, w2)
        y2_ref[n] = y
        s1 = s1 + jnp.sum(y, axis=1, keepdims=True)
        s2 = s2 + jnp.sum(y * y, axis=1, keepdims=True)
    scale2, shift2 = bn_affine(s1, s2, bnp_ref[:, 2:3], bnp_ref[:, 3:4])

    # ---- pass 3: BN2 + residual add + final ReLU -----------------------------
    for n in range(N):
        res = x_ref[n].astype(jnp.float32) + y2_ref[n] * scale2 + shift2
        o_ref[n] = jnp.maximum(res, 0.0).astype(o_ref.dtype)


def light_residual_block(x_nchw, params):
    """params = (w1, b1, g1, be1, w2, b2, g2, be2) in PyTorch conventions."""
    w1, _b1, g1, be1, w2, _b2, g2, be2 = params   # conv biases cancel (train-mode BN)
    N, C, H, W = x_nchw.shape
    HW = H * W
    PC = ((C + 7) // 8) * 8                        # pad channels to sublane tile

    xf = jnp.pad(x_nchw.reshape(N, C, HW).astype(jnp.float32),
                 ((0, 0), (0, PC - C), (0, 0)))

    def pack_w(w):
        wp = jnp.pad(w.astype(jnp.float32),
                     ((0, PC - C), (0, PC - C), (0, 0), (0, 0)))
        # OIHW -> (C_out, ky, kx, c_in) -> (PC, 9*PC), tap-major then c_in
        return jnp.transpose(wp, (0, 2, 3, 1)).reshape(PC, 9 * PC)

    w1col = pack_w(w1)
    w2col = pack_w(w2)

    cpad = (0, PC - C)                             # padded gamma/beta = 0 keeps
    bnp = jnp.stack([jnp.pad(g1.astype(jnp.float32), cpad),   # padded channels
                     jnp.pad(be1.astype(jnp.float32), cpad),  # identically zero
                     jnp.pad(g2.astype(jnp.float32), cpad),
                     jnp.pad(be2.astype(jnp.float32), cpad)], axis=1)  # (PC, 4)

    # Boundary-validity masks, tap-major, replicated across PC channel sublanes.
    pos = jnp.arange(HW, dtype=jnp.int32)
    hh = pos // W
    ww = pos % W
    rows = []
    for ky in range(3):
        for kx in range(3):
            dy, dx = ky - 1, kx - 1
            valid = ((hh + dy >= 0) & (hh + dy < H) &
                     (ww + dx >= 0) & (ww + dx < W)).astype(jnp.float32)
            rows.append(jnp.broadcast_to(valid[None, :], (PC, HW)))
    masks = jnp.concatenate(rows, axis=0)          # (9*PC, HW)

    kernel = functools.partial(_fused_kernel, N=N, H=H, W=W, PC=PC)

    out_padded = pl.pallas_call(
        kernel,
        grid=(1,),
        in_specs=[
            pl.BlockSpec((N, PC, HW), lambda i: (0, 0, 0)),
            pl.BlockSpec((PC, 9 * PC), lambda i: (0, 0)),
            pl.BlockSpec((PC, 9 * PC), lambda i: (0, 0)),
            pl.BlockSpec((PC, 4), lambda i: (0, 0)),
            pl.BlockSpec((9 * PC, HW), lambda i: (0, 0)),
        ],
        out_specs=pl.BlockSpec((N, PC, HW), lambda i: (0, 0, 0)),
        out_shape=jax.ShapeDtypeStruct((N, PC, HW), x_nchw.dtype),
        scratch_shapes=[pltpu.VMEM((N, PC, HW), jnp.float32),
                        pltpu.VMEM((N, PC, HW), jnp.float32)],
        compiler_params=pltpu.CompilerParams(
            dimension_semantics=("arbitrary",)),
    )(xf, w1col, w2col, bnp, masks)

    return out_padded[:, :C, :].reshape(N, C, H, W)


def reference(x, params):
    """Pure-JAX reference matching the PyTorch forward (training-mode BN)."""
    w1, b1, g1, be1, w2, b2, g2, be2 = params

    def conv(x, w, b):
        y = jax.lax.conv_general_dilated(
            x, w, (1, 1), ((1, 1), (1, 1)),
            dimension_numbers=('NCHW', 'OIHW', 'NCHW'))
        return y + b[None, :, None, None]

    def bn(x, g, be):
        m = jnp.mean(x, axis=(0, 2, 3), keepdims=True)
        v = jnp.mean((x - m) ** 2, axis=(0, 2, 3), keepdims=True)
        return (x - m) / jnp.sqrt(v + _EPS) * g[None, :, None, None] \
            + be[None, :, None, None]

    y = jax.nn.relu(bn(conv(x, w1, b1), g1, be1))
    y = bn(conv(y, w2, b2), g2, be2)
    return jax.nn.relu(x + y)


if __name__ == "__main__":
    N, C, H, W = 2, 4, 16, 16
    keys = jax.random.split(jax.random.PRNGKey(0), 9)

    x = jax.random.normal(keys[0], (N, C, H, W), jnp.float32)
    w1 = 0.2 * jax.random.normal(keys[1], (C, C, 3, 3), jnp.float32)
    b1 = 0.1 * jax.random.normal(keys[2], (C,), jnp.float32)
    g1 = 1.0 + 0.1 * jax.random.normal(keys[3], (C,), jnp.float32)
    be1 = 0.1 * jax.random.normal(keys[4], (C,), jnp.float32)
    w2 = 0.2 * jax.random.normal(keys[5], (C, C, 3, 3), jnp.float32)
    b2 = 0.1 * jax.random.normal(keys[6], (C,), jnp.float32)
    g2 = 1.0 + 0.1 * jax.random.normal(keys[7], (C,), jnp.float32)
    be2 = 0.1 * jax.random.normal(keys[8], (C,), jnp.float32)
    params = (w1, b1, g1, be1, w2, b2, g2, be2)

    out = light_residual_block(x, params)
    jax.block_until_ready(out)

    ref = reference(x, params)
    err = float(jnp.max(jnp.abs(out - ref)))
    assert err < 5e-4, f"max abs error {err}"
    print("KERNEL_OK")
</pallas_src>

<mosaic_0001>
module attributes {stable_mosaic.version = 11 : i64} {
  func.func @_fused_kernel(%arg0: i32, %arg1: memref<2x8x256xf32, #tpu.memory_space<vmem>>, %arg2: memref<8x72xf32, #tpu.memory_space<vmem>>, %arg3: memref<8x72xf32, #tpu.memory_space<vmem>>, %arg4: memref<8x4xf32, #tpu.memory_space<vmem>>, %arg5: memref<72x256xf32, #tpu.memory_space<vmem>>, %arg6: memref<2x8x256xf32, #tpu.memory_space<vmem>>, %arg7: memref<2x8x256xf32, #tpu.memory_space<vmem>>, %arg8: memref<2x8x256xf32, #tpu.memory_space<vmem>>) attributes {dimension_semantics = [#tpu.dimension_semantics<arbitrary>], iteration_bounds = array<i64: 1>, scalar_prefetch = 0 : i64, scratch_operands = 2 : i64, tpu.core_type = #tpu.core_type<tc>, window_params = [{pipeline_mode = #tpu.pipeline_mode<synchronous>, transform_indices = @transform_0, window_bounds = array<i64: 2, 8, 256>}, {pipeline_mode = #tpu.pipeline_mode<synchronous>, transform_indices = @transform_1, window_bounds = array<i64: 8, 72>}, {pipeline_mode = #tpu.pipeline_mode<synchronous>, transform_indices = @transform_2, window_bounds = array<i64: 8, 72>}, {pipeline_mode = #tpu.pipeline_mode<synchronous>, transform_indices = @transform_3, window_bounds = array<i64: 8, 4>}, {pipeline_mode = #tpu.pipeline_mode<synchronous>, transform_indices = @transform_4, window_bounds = array<i64: 72, 256>}, {pipeline_mode = #tpu.pipeline_mode<synchronous>, transform_indices = @transform_5, window_bounds = array<i64: 2, 8, 256>}]} {
    %c0 = arith.constant 0 : index
    %c0_0 = arith.constant 0 : index
    %0 = vector.load %arg2[%c0, %c0_0] : memref<8x72xf32, #tpu.memory_space<vmem>>, vector<8x72xf32>
    %c0_1 = arith.constant 0 : index
    %c0_2 = arith.constant 0 : index
    %1 = vector.load %arg3[%c0_1, %c0_2] : memref<8x72xf32, #tpu.memory_space<vmem>>, vector<8x72xf32>
    %c0_3 = arith.constant 0 : index
    %c0_4 = arith.constant 0 : index
    %2 = vector.load %arg5[%c0_3, %c0_4] : memref<72x256xf32, #tpu.memory_space<vmem>>, vector<72x256xf32>
    %cst = arith.constant 0.000000e+00 : f32
    %3 = vector.broadcast %cst : f32 to vector<8x1xf32>
    %cst_5 = arith.constant 0.000000e+00 : f32
    %4 = vector.broadcast %cst_5 : f32 to vector<8x1xf32>
    %c0_6 = arith.constant 0 : index
    %c0_7 = arith.constant 0 : index
    %c0_8 = arith.constant 0 : index
    %5 = vector.load %arg1[%c0_6, %c0_7, %c0_8] : memref<2x8x256xf32, #tpu.memory_space<vmem>>, vector<1x8x256xf32>
    %6 = vector.shape_cast %5 : vector<1x8x256xf32> to vector<8x256xf32>
    %c17_i32 = arith.constant 17 : i32
    %7 = tpu.dynamic_rotate %6 by %c17_i32 dim 1 : vector<8x256xf32>, i32 -> vector<8x256xf32>
    %c16_i32 = arith.constant 16 : i32
    %8 = tpu.dynamic_rotate %6 by %c16_i32 dim 1 : vector<8x256xf32>, i32 -> vector<8x256xf32>
    %c15_i32 = arith.constant 15 : i32
    %9 = tpu.dynamic_rotate %6 by %c15_i32 dim 1 : vector<8x256xf32>, i32 -> vector<8x256xf32>
    %c1_i32 = arith.constant 1 : i32
    %10 = tpu.dynamic_rotate %6 by %c1_i32 dim 1 : vector<8x256xf32>, i32 -> vector<8x256xf32>
    %c255_i32 = arith.constant 255 : i32
    %11 = tpu.dynamic_rotate %6 by %c255_i32 dim 1 : vector<8x256xf32>, i32 -> vector<8x256xf32>
    %c241_i32 = arith.constant 241 : i32
    %12 = tpu.dynamic_rotate %6 by %c241_i32 dim 1 : vector<8x256xf32>, i32 -> vector<8x256xf32>
    %c240_i32 = arith.constant 240 : i32
    %13 = tpu.dynamic_rotate %6 by %c240_i32 dim 1 : vector<8x256xf32>, i32 -> vector<8x256xf32>
    %c239_i32 = arith.constant 239 : i32
    %14 = tpu.dynamic_rotate %6 by %c239_i32 dim 1 : vector<8x256xf32>, i32 -> vector<8x256xf32>
    %15 = tpu.concatenate %7, %8, %9, %10, %6, %11, %12, %13, %14 in 0 : vector<8x256xf32>, vector<8x256xf32>, vector<8x256xf32>, vector<8x256xf32>, vector<8x256xf32>, vector<8x256xf32>, vector<8x256xf32>, vector<8x256xf32>, vector<8x256xf32> -> vector<72x256xf32>
    %16 = arith.mulf %15, %2 : vector<72x256xf32>
    %cst_9 = arith.constant dense<0.000000e+00> : vector<8x256xf32>
    %17 = tpu.matmul %0, %16, %cst_9 {dimension_numbers = #tpu.dot_dimension_numbers<[1], [0], [0], [1], [0, 0, 1, 1], [], []>} : vector<8x72xf32>, vector<72x256xf32>, vector<8x256xf32> -> vector<8x256xf32>
    %c0_10 = arith.constant 0 : index
    %c0_11 = arith.constant 0 : index
    %c0_12 = arith.constant 0 : index
    %18 = vector.load %arg7[%c0_10, %c0_11, %c0_12] : memref<2x8x256xf32, #tpu.memory_space<vmem>>, vector<1x8x256xf32>
    %19 = vector.shape_cast %18 : vector<1x8x256xf32> to vector<8x256xf32>
    %20 = vector.shape_cast %17 : vector<8x256xf32> to vector<1x8x256xf32>
    tpu.vector_store %arg7[%c0_10, %c0_11, %c0_12], %20 {strides = array<i32>} : memref<2x8x256xf32, #tpu.memory_space<vmem>>, vector<1x8x256xf32>,
    %cst_13 = arith.constant dense<0.000000e+00> : vector<8xf32>
    %21 = vector.multi_reduction <add>, %17, %cst_13 [1] : vector<8x256xf32> to vector<8xf32>
    %22 = vector.shape_cast %21 : vector<8xf32> to vector<8x1xf32>
    %23 = arith.addf %3, %22 : vector<8x1xf32>
    %24 = arith.mulf %17, %17 : vector<8x256xf32>
    %cst_14 = arith.constant dense<0.000000e+00> : vector<8xf32>
    %25 = vector.multi_reduction <add>, %24, %cst_14 [1] : vector<8x256xf32> to vector<8xf32>
    %26 = vector.shape_cast %25 : vector<8xf32> to vector<8x1xf32>
    %27 = arith.addf %4, %26 : vector<8x1xf32>
    %c1 = arith.constant 1 : index
    %c0_15 = arith.constant 0 : index
    %c0_16 = arith.constant 0 : index
    %28 = vector.load %arg1[%c1, %c0_15, %c0_16] : memref<2x8x256xf32, #tpu.memory_space<vmem>>, vector<1x8x256xf32>
    %29 = vector.shape_cast %28 : vector<1x8x256xf32> to vector<8x256xf32>
    %c17_i32_17 = arith.constant 17 : i32
    %30 = tpu.dynamic_rotate %29 by %c17_i32_17 dim 1 : vector<8x256xf32>, i32 -> vector<8x256xf32>
    %c16_i32_18 = arith.constant 16 : i32
    %31 = tpu.dynamic_rotate %29 by %c16_i32_18 dim 1 : vector<8x256xf32>, i32 -> vector<8x256xf32>
    %c15_i32_19 = arith.constant 15 : i32
    %32 = tpu.dynamic_rotate %29 by %c15_i32_19 dim 1 : vector<8x256xf32>, i32 -> vector<8x256xf32>
    %c1_i32_20 = arith.constant 1 : i32
    %33 = tpu.dynamic_rotate %29 by %c1_i32_20 dim 1 : vector<8x256xf32>, i32 -> vector<8x256xf32>
    %c255_i32_21 = arith.constant 255 : i32
    %34 = tpu.dynamic_rotate %29 by %c255_i32_21 dim 1 : vector<8x256xf32>, i32 -> vector<8x256xf32>
    %c241_i32_22 = arith.constant 241 : i32
    %35 = tpu.dynamic_rotate %29 by %c241_i32_22 dim 1 : vector<8x256xf32>, i32 -> vector<8x256xf32>
    %c240_i32_23 = arith.constant 240 : i32
    %36 = tpu.dynamic_rotate %29 by %c240_i32_23 dim 1 : vector<8x256xf32>, i32 -> vector<8x256xf32>
    %c239_i32_24 = arith.constant 239 : i32
    %37 = tpu.dynamic_rotate %29 by %c239_i32_24 dim 1 : vector<8x256xf32>, i32 -> vector<8x256xf32>
    %38 = tpu.concatenate %30, %31, %32, %33, %29, %34, %35, %36, %37 in 0 : vector<8x256xf32>, vector<8x256xf32>, vector<8x256xf32>, vector<8x256xf32>, vector<8x256xf32>, vector<8x256xf32>, vector<8x256xf32>, vector<8x256xf32>, vector<8x256xf32> -> vector<72x256xf32>
    %39 = arith.mulf %38, %2 : vector<72x256xf32>
    %cst_25 = arith.constant dense<0.000000e+00> : vector<8x256xf32>
    %40 = tpu.matmul %0, %39, %cst_25 {dimension_numbers = #tpu.dot_dimension_numbers<[1], [0], [0], [1], [0, 0, 1, 1], [], []>} : vector<8x72xf32>, vector<72x256xf32>, vector<8x256xf32> -> vector<8x256xf32>
    %c1_26 = arith.constant 1 : index
    %c0_27 = arith.constant 0 : index
    %c0_28 = arith.constant 0 : index
    %41 = vector.load %arg7[%c1_26, %c0_27, %c0_28] : memref<2x8x256xf32, #tpu.memory_space<vmem>>, vector<1x8x256xf32>
    %42 = vector.shape_cast %41 : vector<1x8x256xf32> to vector<8x256xf32>
    %43 = vector.shape_cast %40 : vector<8x256xf32> to vector<1x8x256xf32>
    tpu.vector_store %arg7[%c1_26, %c0_27, %c0_28], %43 {strides = array<i32>} : memref<2x8x256xf32, #tpu.memory_space<vmem>>, vector<1x8x256xf32>,
    %cst_29 = arith.constant dense<0.000000e+00> : vector<8xf32>
    %44 = vector.multi_reduction <add>, %40, %cst_29 [1] : vector<8x256xf32> to vector<8xf32>
    %45 = vector.shape_cast %44 : vector<8xf32> to vector<8x1xf32>
    %46 = arith.addf %23, %45 : vector<8x1xf32>
    %47 = arith.mulf %40, %40 : vector<8x256xf32>
    %cst_30 = arith.constant dense<0.000000e+00> : vector<8xf32>
    %48 = vector.multi_reduction <add>, %47, %cst_30 [1] : vector<8x256xf32> to vector<8xf32>
    %49 = vector.shape_cast %48 : vector<8xf32> to vector<8x1xf32>
    %50 = arith.addf %27, %49 : vector<8x1xf32>
    %c0_31 = arith.constant 0 : index
    %c0_32 = arith.constant 0 : index
    %51 = vector.load %arg4[%c0_31, %c0_32] : memref<8x4xf32, #tpu.memory_space<vmem>>, vector<8x1xf32>
    %c0_33 = arith.constant 0 : index
    %c1_34 = arith.constant 1 : index
    %52 = vector.load %arg4[%c0_33, %c1_34] : memref<8x4xf32, #tpu.memory_space<vmem>>, vector<8x1xf32>
    %cst_35 = arith.constant 0.001953125 : f32
    %53 = vector.broadcast %cst_35 : f32 to vector<8x1xf32>
    %54 = arith.mulf %46, %53 : vector<8x1xf32>
    %cst_36 = arith.constant 0.001953125 : f32
    %55 = vector.broadcast %cst_36 : f32 to vector<8x1xf32>
    %56 = arith.mulf %50, %55 : vector<8x1xf32>
    %57 = arith.mulf %54, %54 : vector<8x1xf32>
    %58 = arith.subf %56, %57 : vector<8x1xf32>
    %cst_37 = arith.constant 9.99999974E-6 : f32
    %59 = vector.broadcast %cst_37 : f32 to vector<8x1xf32>
    %60 = arith.addf %58, %59 : vector<8x1xf32>
    %61 = math.rsqrt %60 : vector<8x1xf32>
    %62 = arith.mulf %51, %61 : vector<8x1xf32>
    %63 = arith.mulf %54, %62 : vector<8x1xf32>
    %64 = arith.subf %52, %63 : vector<8x1xf32>
    %cst_38 = arith.constant 0.000000e+00 : f32
    %65 = vector.broadcast %cst_38 : f32 to vector<8x1xf32>
    %cst_39 = arith.constant 0.000000e+00 : f32
    %66 = vector.broadcast %cst_39 : f32 to vector<8x1xf32>
    %c0_40 = arith.constant 0 : index
    %c0_41 = arith.constant 0 : index
    %c0_42 = arith.constant 0 : index
    %67 = vector.load %arg7[%c0_40, %c0_41, %c0_42] : memref<2x8x256xf32, #tpu.memory_space<vmem>>, vector<1x8x256xf32>
    %68 = vector.shape_cast %67 : vector<1x8x256xf32> to vector<8x256xf32>
    %69 = vector.broadcast %62 : vector<8x1xf32> to vector<8x256xf32>
    %70 = arith.mulf %68, %69 : vector<8x256xf32>
    %71 = vector.broadcast %64 : vector<8x1xf32> to vector<8x256xf32>
    %72 = arith.addf %70, %71 : vector<8x256xf32>
    %cst_43 = arith.constant 0.000000e+00 : f32
    %73 = vector.broadcast %cst_43 : f32 to vector<8x256xf32>
    %74 = arith.maximumf %72, %73 : vector<8x256xf32>
    %c17_i32_44 = arith.constant 17 : i32
    %75 = tpu.dynamic_rotate %74 by %c17_i32_44 dim 1 : vector<8x256xf32>, i32 -> vector<8x256xf32>
    %c16_i32_45 = arith.constant 16 : i32
    %76 = tpu.dynamic_rotate %74 by %c16_i32_45 dim 1 : vector<8x256xf32>, i32 -> vector<8x256xf32>
    %c15_i32_46 = arith.constant 15 : i32
    %77 = tpu.dynamic_rotate %74 by %c15_i32_46 dim 1 : vector<8x256xf32>, i32 -> vector<8x256xf32>
    %c1_i32_47 = arith.constant 1 : i32
    %78 = tpu.dynamic_rotate %74 by %c1_i32_47 dim 1 : vector<8x256xf32>, i32 -> vector<8x256xf32>
    %c255_i32_48 = arith.constant 255 : i32
    %79 = tpu.dynamic_rotate %74 by %c255_i32_48 dim 1 : vector<8x256xf32>, i32 -> vector<8x256xf32>
    %c241_i32_49 = arith.constant 241 : i32
    %80 = tpu.dynamic_rotate %74 by %c241_i32_49 dim 1 : vector<8x256xf32>, i32 -> vector<8x256xf32>
    %c240_i32_50 = arith.constant 240 : i32
    %81 = tpu.dynamic_rotate %74 by %c240_i32_50 dim 1 : vector<8x256xf32>, i32 -> vector<8x256xf32>
    %c239_i32_51 = arith.constant 239 : i32
    %82 = tpu.dynamic_rotate %74 by %c239_i32_51 dim 1 : vector<8x256xf32>, i32 -> vector<8x256xf32>
    %83 = tpu.concatenate %75, %76, %77, %78, %74, %79, %80, %81, %82 in 0 : vector<8x256xf32>, vector<8x256xf32>, vector<8x256xf32>, vector<8x256xf32>, vector<8x256xf32>, vector<8x256xf32>, vector<8x256xf32>, vector<8x256xf32>, vector<8x256xf32> -> vector<72x256xf32>
    %84 = arith.mulf %83, %2 : vector<72x256xf32>
    %cst_52 = arith.constant dense<0.000000e+00> : vector<8x256xf32>
    %85 = tpu.matmul %1, %84, %cst_52 {dimension_numbers = #tpu.dot_dimension_numbers<[1], [0], [0], [1], [0, 0, 1, 1], [], []>} : vector<8x72xf32>, vector<72x256xf32>, vector<8x256xf32> -> vector<8x256xf32>
    %c0_53 = arith.constant 0 : index
    %c0_54 = arith.constant 0 : index
    %c0_55 = arith.constant 0 : index
    %86 = vector.load %arg8[%c0_53, %c0_54, %c0_55] : memref<2x8x256xf32, #tpu.memory_space<vmem>>, vector<1x8x256xf32>
    %87 = vector.shape_cast %86 : vector<1x8x256xf32> to vector<8x256xf32>
    %88 = vector.shape_cast %85 : vector<8x256xf32> to vector<1x8x256xf32>
    tpu.vector_store %arg8[%c0_53, %c0_54, %c0_55], %88 {strides = array<i32>} : memref<2x8x256xf32, #tpu.memory_space<vmem>>, vector<1x8x256xf32>,
    %cst_56 = arith.constant dense<0.000000e+00> : vector<8xf32>
    %89 = vector.multi_reduction <add>, %85, %cst_56 [1] : vector<8x256xf32> to vector<8xf32>
    %90 = vector.shape_cast %89 : vector<8xf32> to vector<8x1xf32>
    %91 = arith.addf %65, %90 : vector<8x1xf32>
    %92 = arith.mulf %85, %85 : vector<8x256xf32>
    %cst_57 = arith.constant dense<0.000000e+00> : vector<8xf32>
    %93 = vector.multi_reduction <add>, %92, %cst_57 [1] : vector<8x256xf32> to vector<8xf32>
    %94 = vector.shape_cast %93 : vector<8xf32> to vector<8x1xf32>
    %95 = arith.addf %66, %94 : vector<8x1xf32>
    %c1_58 = arith.constant 1 : index
    %c0_59 = arith.constant 0 : index
    %c0_60 = arith.constant 0 : index
    %96 = vector.load %arg7[%c1_58, %c0_59, %c0_60] : memref<2x8x256xf32, #tpu.memory_space<vmem>>, vector<1x8x256xf32>
    %97 = vector.shape_cast %96 : vector<1x8x256xf32> to vector<8x256xf32>
    %98 = vector.broadcast %62 : vector<8x1xf32> to vector<8x256xf32>
    %99 = arith.mulf %97, %98 : vector<8x256xf32>
    %100 = vector.broadcast %64 : vector<8x1xf32> to vector<8x256xf32>
    %101 = arith.addf %99, %100 : vector<8x256xf32>
    %cst_61 = arith.constant 0.000000e+00 : f32
    %102 = vector.broadcast %cst_61 : f32 to vector<8x256xf32>
    %103 = arith.maximumf %101, %102 : vector<8x256xf32>
    %c17_i32_62 = arith.constant 17 : i32
    %104 = tpu.dynamic_rotate %103 by %c17_i32_62 dim 1 : vector<8x256xf32>, i32 -> vector<8x256xf32>
    %c16_i32_63 = arith.constant 16 : i32
    %105 = tpu.dynamic_rotate %103 by %c16_i32_63 dim 1 : vector<8x256xf32>, i32 -> vector<8x256xf32>
    %c15_i32_64 = arith.constant 15 : i32
    %106 = tpu.dynamic_rotate %103 by %c15_i32_64 dim 1 : vector<8x256xf32>, i32 -> vector<8x256xf32>
    %c1_i32_65 = arith.constant 1 : i32
    %107 = tpu.dynamic_rotate %103 by %c1_i32_65 dim 1 : vector<8x256xf32>, i32 -> vector<8x256xf32>
    %c255_i32_66 = arith.constant 255 : i32
    %108 = tpu.dynamic_rotate %103 by %c255_i32_66 dim 1 : vector<8x256xf32>, i32 -> vector<8x256xf32>
    %c241_i32_67 = arith.constant 241 : i32
    %109 = tpu.dynamic_rotate %103 by %c241_i32_67 dim 1 : vector<8x256xf32>, i32 -> vector<8x256xf32>
    %c240_i32_68 = arith.constant 240 : i32
    %110 = tpu.dynamic_rotate %103 by %c240_i32_68 dim 1 : vector<8x256xf32>, i32 -> vector<8x256xf32>
    %c239_i32_69 = arith.constant 239 : i32
    %111 = tpu.dynamic_rotate %103 by %c239_i32_69 dim 1 : vector<8x256xf32>, i32 -> vector<8x256xf32>
    %112 = tpu.concatenate %104, %105, %106, %107, %103, %108, %109, %110, %111 in 0 : vector<8x256xf32>, vector<8x256xf32>, vector<8x256xf32>, vector<8x256xf32>, vector<8x256xf32>, vector<8x256xf32>, vector<8x256xf32>, vector<8x256xf32>, vector<8x256xf32> -> vector<72x256xf32>
    %113 = arith.mulf %112, %2 : vector<72x256xf32>
    %cst_70 = arith.constant dense<0.000000e+00> : vector<8x256xf32>
    %114 = tpu.matmul %1, %113, %cst_70 {dimension_numbers = #tpu.dot_dimension_numbers<[1], [0], [0], [1], [0, 0, 1, 1], [], []>} : vector<8x72xf32>, vector<72x256xf32>, vector<8x256xf32> -> vector<8x256xf32>
    %c1_71 = arith.constant 1 : index
    %c0_72 = arith.constant 0 : index
    %c0_73 = arith.constant 0 : index
    %115 = vector.load %arg8[%c1_71, %c0_72, %c0_73] : memref<2x8x256xf32, #tpu.memory_space<vmem>>, vector<1x8x256xf32>
    %116 = vector.shape_cast %115 : vector<1x8x256xf32> to vector<8x256xf32>
    %117 = vector.shape_cast %114 : vector<8x256xf32> to vector<1x8x256xf32>
    tpu.vector_store %arg8[%c1_71, %c0_72, %c0_73], %117 {strides = array<i32>} : memref<2x8x256xf32, #tpu.memory_space<vmem>>, vector<1x8x256xf32>,
    %cst_74 = arith.constant dense<0.000000e+00> : vector<8xf32>
    %118 = vector.multi_reduction <add>, %114, %cst_74 [1] : vector<8x256xf32> to vector<8xf32>
    %119 = vector.shape_cast %118 : vector<8xf32> to vector<8x1xf32>
    %120 = arith.addf %91, %119 : vector<8x1xf32>
    %121 = arith.mulf %114, %114 : vector<8x256xf32>
    %cst_75 = arith.constant dense<0.000000e+00> : vector<8xf32>
    %122 = vector.multi_reduction <add>, %121, %cst_75 [1] : vector<8x256xf32> to vector<8xf32>
    %123 = vector.shape_cast %122 : vector<8xf32> to vector<8x1xf32>
    %124 = arith.addf %95, %123 : vector<8x1xf32>
    %c0_76 = arith.constant 0 : index
    %c2 = arith.constant 2 : index
    %125 = vector.load %arg4[%c0_76, %c2] : memref<8x4xf32, #tpu.memory_space<vmem>>, vector<8x1xf32>
    %c0_77 = arith.constant 0 : index
    %c3 = arith.constant 3 : index
    %126 = vector.load %arg4[%c0_77, %c3] : memref<8x4xf32, #tpu.memory_space<vmem>>, vector<8x1xf32>
    %cst_78 = arith.constant 0.001953125 : f32
    %127 = vector.broadcast %cst_78 : f32 to vector<8x1xf32>
    %128 = arith.mulf %120, %127 : vector<8x1xf32>
    %cst_79 = arith.constant 0.001953125 : f32
    %129 = vector.broadcast %cst_79 : f32 to vector<8x1xf32>
    %130 = arith.mulf %124, %129 : vector<8x1xf32>
    %131 = arith.mulf %128, %128 : vector<8x1xf32>
    %132 = arith.subf %130, %131 : vector<8x1xf32>
    %cst_80 = arith.constant 9.99999974E-6 : f32
    %133 = vector.broadcast %cst_80 : f32 to vector<8x1xf32>
    %134 = arith.addf %132, %133 : vector<8x1xf32>
    %135 = math.rsqrt %134 : vector<8x1xf32>
    %136 = arith.mulf %125, %135 : vector<8x1xf32>
    %137 = arith.mulf %128, %136 : vector<8x1xf32>
    %138 = arith.subf %126, %137 : vector<8x1xf32>
    %c0_81 = arith.constant 0 : index
    %c0_82 = arith.constant 0 : index
    %c0_83 = arith.constant 0 : index
    %139 = vector.load %arg1[%c0_81, %c0_82, %c0_83] : memref<2x8x256xf32, #tpu.memory_space<vmem>>, vector<1x8x256xf32>
    %140 = vector.shape_cast %139 : vector<1x8x256xf32> to vector<8x256xf32>
    %c0_84 = arith.constant 0 : index
    %c0_85 = arith.constant 0 : index
    %c0_86 = arith.constant 0 : index
    %141 = vector.load %arg8[%c0_84, %c0_85, %c0_86] : memref<2x8x256xf32, #tpu.memory_space<vmem>>, vector<1x8x256xf32>
    %142 = vector.shape_cast %141 : vector<1x8x256xf32> to vector<8x256xf32>
    %143 = vector.broadcast %136 : vector<8x1xf32> to vector<8x256xf32>
    %144 = arith.mulf %142, %143 : vector<8x256xf32>
    %145 = arith.addf %140, %144 : vector<8x256xf32>
    %146 = vector.broadcast %138 : vector<8x1xf32> to vector<8x256xf32>
    %147 = arith.addf %145, %146 : vector<8x256xf32>
    %cst_87 = arith.constant 0.000000e+00 : f32
    %148 = vector.broadcast %cst_87 : f32 to vector<8x256xf32>
    %149 = arith.maximumf %147, %148 : vector<8x256xf32>
    %c0_88 = arith.constant 0 : index
    %c0_89 = arith.constant 0 : index
    %c0_90 = arith.constant 0 : index
    %150 = vector.load %arg6[%c0_88, %c0_89, %c0_90] : memref<2x8x256xf32, #tpu.memory_space<vmem>>, vector<1x8x256xf32>
    %151 = vector.shape_cast %150 : vector<1x8x256xf32> to vector<8x256xf32>
    %152 = vector.shape_cast %149 : vector<8x256xf32> to vector<1x8x256xf32>
    tpu.vector_store %arg6[%c0_88, %c0_89, %c0_90], %152 {strides = array<i32>} : memref<2x8x256xf32, #tpu.memory_space<vmem>>, vector<1x8x256xf32>,
    %c1_91 = arith.constant 1 : index
    %c0_92 = arith.constant 0 : index
    %c0_93 = arith.constant 0 : index
    %153 = vector.load %arg1[%c1_91, %c0_92, %c0_93] : memref<2x8x256xf32, #tpu.memory_space<vmem>>, vector<1x8x256xf32>
    %154 = vector.shape_cast %153 : vector<1x8x256xf32> to vector<8x256xf32>
    %c1_94 = arith.constant 1 : index
    %c0_95 = arith.constant 0 : index
    %c0_96 = arith.constant 0 : index
    %155 = vector.load %arg8[%c1_94, %c0_95, %c0_96] : memref<2x8x256xf32, #tpu.memory_space<vmem>>, vector<1x8x256xf32>
    %156 = vector.shape_cast %155 : vector<1x8x256xf32> to vector<8x256xf32>
    %157 = vector.broadcast %136 : vector<8x1xf32> to vector<8x256xf32>
    %158 = arith.mulf %156, %157 : vector<8x256xf32>
    %159 = arith.addf %154, %158 : vector<8x256xf32>
    %160 = vector.broadcast %138 : vector<8x1xf32> to vector<8x256xf32>
    %161 = arith.addf %159, %160 : vector<8x256xf32>
    %cst_97 = arith.constant 0.000000e+00 : f32
    %162 = vector.broadcast %cst_97 : f32 to vector<8x256xf32>
    %163 = arith.maximumf %161, %162 : vector<8x256xf32>
    %c1_98 = arith.constant 1 : index
    %c0_99 = arith.constant 0 : index
    %c0_100 = arith.constant 0 : index
    %164 = vector.load %arg6[%c1_98, %c0_99, %c0_100] : memref<2x8x256xf32, #tpu.memory_space<vmem>>, vector<1x8x256xf32>
    %165 = vector.shape_cast %164 : vector<1x8x256xf32> to vector<8x256xf32>
    %166 = vector.shape_cast %163 : vector<8x256xf32> to vector<1x8x256xf32>
    tpu.vector_store %arg6[%c1_98, %c0_99, %c0_100], %166 {strides = array<i32>} : memref<2x8x256xf32, #tpu.memory_space<vmem>>, vector<1x8x256xf32>,
    return
  }
  func.func @transform_0(%arg0: i32) -> (i32, i32, i32) {
    %c0_i32 = arith.constant 0 : i32
    %c0_i32_0 = arith.constant 0 : i32
    %c0_i32_1 = arith.constant 0 : i32
    %c0_i32_2 = arith.constant 0 : i32
    return %c0_i32, %c0_i32_0, %c0_i32_1 : i32, i32, i32
  }
  func.func @transform_1(%arg0: i32) -> (i32, i32) {
    %c0_i32 = arith.constant 0 : i32
    %c0_i32_0 = arith.constant 0 : i32
    %c0_i32_1 = arith.constant 0 : i32
    return %c0_i32, %c0_i32_0 : i32, i32
  }
  func.func @transform_2(%arg0: i32) -> (i32, i32) {
    %c0_i32 = arith.constant 0 : i32
    %c0_i32_0 = arith.constant 0 : i32
    %c0_i32_1 = arith.constant 0 : i32
    return %c0_i32, %c0_i32_0 : i32, i32
  }
  func.func @transform_3(%arg0: i32) -> (i32, i32) {
    %c0_i32 = arith.constant 0 : i32
    %c0_i32_0 = arith.constant 0 : i32
    %c0_i32_1 = arith.constant 0 : i32
    return %c0_i32, %c0_i32_0 : i32, i32
  }
  func.func @transform_4(%arg0: i32) -> (i32, i32) {
    %c0_i32 = arith.constant 0 : i32
    %c0_i32_0 = arith.constant 0 : i32
    %c0_i32_1 = arith.constant 0 : i32
    return %c0_i32, %c0_i32_0 : i32, i32
  }
  func.func @transform_5(%arg0: i32) -> (i32, i32, i32) {
    %c0_i32 = arith.constant 0 : i32
    %c0_i32_0 = arith.constant 0 : i32
    %c0_i32_1 = arith.constant 0 : i32
    %c0_i32_2 = arith.constant 0 : i32
    return %c0_i32, %c0_i32_0, %c0_i32_1 : i32, i32, i32
  }
}

</mosaic_0001>

<bundles_post_ra>
// kernel: tpu_custom_call.1
= control target key start
LH: loop header
LB: loop body
LE: loop exit
PB: predicated region body
PF: predicated region fallthrough
CT: control target
= control target key end

     0   :  { %10 = vsyncpa [#allocation5], 0  ;;  %s1485_s0 = inlined_call_operand.hbm [shape: f32[2,8,256], index: 0, kind: input, shape index: {}]   ;;  %s1486_s1 = inlined_call_operand.vmem [shape: f32[8,72], index: 1, kind: input, shape index: {}]   ;;  %s1487_s2 = inlined_call_operand.vmem [shape: f32[8,72], index: 2, kind: input, shape index: {}]   ;;  %s1488_s3 = inlined_call_operand.vmem [shape: f32[8,4], index: 3, kind: input, shape index: {}]   ;;  %s1489_s4 = inlined_call_operand.hbm [shape: f32[72,256], index: 4, kind: input, shape index: {}]   ;;  %s1490_s5 = inlined_call_operand.hbm [shape: f32[2,8,256], index: 5, kind: output, shape index: {}]  }
   0x1   :  { %11 = vsyncpa [#allocation8], 0 }
   0x2   :  { %12 = vsyncpa [#allocation6], 0  ;;  %s966_s18 = smov [#allocation4]   ;;  %s894_s22 = scalar_lea.hbm %s1485_s0, 512 }
   0x3   :  { %s18_s19 = sshll.u32 %s966_s18, 4  ;;  %p895_p0 = scmp.ne.s32.totalorder %s1485_s0, %s894_s22  ;;  %s19_s19 = int_to_ptr.vmem [resolvable:$true] %s18_s19 }
   0x4   :  { %p898_p1 = scmp.lt.u32.totalorder %s894_s22, %s1485_s0 }
   0x6   :  { %p900_p2 = pnand %p898_p1, %p895_p0 }
   0x8   :  { %903 = shalt.err (!%p900_p2)
}
   0x9   :  { %s904_s27 = scalar_lea.vmem %s19_s19, 512  ;;  %p909_p4 = scmp.lt.s32.totalorder %s19_s19, %s19_s19 }
   0xa   :  { %p905_p3 = scmp.ne.s32.totalorder %s19_s19, %s904_s27  ;;  %p910_p5 = scmp.lt.s32.totalorder %s904_s27, %s904_s27 }
   0xc   :  { %p911_p6 = por %p910_p5, %p909_p4 }
   0xe   :  { %p912_p7 = pnand %p911_p6, %p905_p3 }
  0x10   :  { %915 = shalt.err (!%p912_p7)
}
  0x11   :  { %s967_s28 = smov 256   ;;  %s968_s29 = smov 16  }
  0x12   :  { %24 = dma.hbm_to_vmem [thread:$0]  %s1485_s0, 512, %s19_s19, [#allocation5], %s967_s28, %s967_s28, %s968_s29  }
  0x13   :  { %s969_s7 = smov [#allocation7]   ;;  %s916_s11 = scalar_lea.hbm %s1489_s4, 2304 }
  0x14   :  { %s36_s8 = sshll.u32 %s969_s7, 4  ;;  %p917_p8 = scmp.ne.s32.totalorder %s1489_s4, %s916_s11  ;;  %s37_s8 = int_to_ptr.vmem [resolvable:$true] %s36_s8 }
  0x15   :  { %p920_p9 = scmp.lt.u32.totalorder %s916_s11, %s1489_s4 }
  0x17   :  { %p922_p10 = pnand %p920_p9, %p917_p8 }
  0x19   :  { %925 = shalt.err (!%p922_p10)
}
  0x1a   :  { %s926_s16 = scalar_lea.vmem %s37_s8, 2304  ;;  %p931_p12 = scmp.lt.s32.totalorder %s37_s8, %s37_s8 }
  0x1b   :  { %p927_p11 = scmp.ne.s32.totalorder %s37_s8, %s926_s16  ;;  %p932_p13 = scmp.lt.s32.totalorder %s926_s16, %s926_s16 }
  0x1d   :  { %p933_p0 = por %p932_p13, %p931_p12 }
  0x1f   :  { %p934_p1 = pnand %p933_p0, %p927_p11 }
  0x21   :  { %937 = shalt.err (!%p934_p1)
}
  0x22   :  { %42 = dma.hbm_to_vmem [thread:$0]  %s1489_s4, 2304, %s37_s8, [#allocation8], %s967_s28, %s967_s28, %s968_s29  }
  0x23   :  { %960 = dma.done.wait [#allocation5], 512  }
  0x24   :  { %961 = vsyncadd [#allocation5], 4294966784 }
  0x25   :  { %962 = dma.done.wait [#allocation8], 2304  }
  0x26   :  { %963 = vsyncadd [#allocation8], 4294964992  ;;  %v1043_v0 = vld [vmem:[#allocation4] sm:$0xff]  ;;  %s970_s18 = smov 17   ;;  %v1049_v1 = vld [vmem:[#allocation4 + $0x8] sm:$0xff]  ;;  %s971_s4 = smov 15   ;;  %v75_v5 = vlaneseq }
  0x27   :  { %80 = vrot.lane.b32.xlu1 %v1043_v0, %s968_s29  ;;  %71 = vrot.lane.b32.xlu0 %v1043_v0, %s970_s18  ;;  %v1055_v2 = vld [vmem:[#allocation4 + $0x18] sm:$0xff]  ;;  %v1057_v3 = vld [vmem:[#allocation4 + $0x10] sm:$0xff]  ;;  %s972_s19 = smov 1   ;;  %s973_s20 = smov 127   ;;  %v976_v4 = vmov 0.0   ;;  %v1123_v10 = vld [vmem:[#allocation7] sm:$0xff] }
  0x28   :  { %s974_s21 = smov 113   ;;  %s975_s22 = smov 112   ;;  %215 = vmatprep.mubr.f32.mxu0 %v976_v4  ;;  %367 = vmatprep.mubr.f32.mxu1 %v976_v4  ;;  %v1117_v6 = vand.u32 127, %v75_v5  ;;  %v1120_v9 = vld [vmem:[#allocation7 + $0x10] sm:$0xff]  ;;  %v1125_v11 = vld [vmem:[#allocation7 + $0x8] sm:$0xff]  ;;  %v1127_v12 = vld [vmem:[#allocation7 + $0x18] sm:$0xff] }
  0x29   :  { %s977_s23 = smov 111   ;;  %v1154_v41 = vld [vmem:[#allocation7 + $0x20] sm:$0xff]  ;;  %v1157_v42 = vld [vmem:[#allocation7 + $0x28] sm:$0xff]  ;;  %v1163_v45 = vld [vmem:[#allocation7 + $0x30] sm:$0xff]  ;;  %vm147_vm8 = vcmask 588800  }
  0x2a   :  { %vm84_vm0 = vcmp.lt.s32.totalorder %v1117_v6, 16  ;;  %vm77_vm1 = vcmp.lt.s32.totalorder %v1117_v6, 17  ;;  %vm91_vm2 = vcmp.lt.s32.totalorder %v1117_v6, 15  ;;  %vm98_vm3 = vcmp.lt.s32.totalorder %v1117_v6, 1  ;;  %v1165_v46 = vld [vmem:[#allocation7 + $0x38] sm:$0xff] }
  0x2b   :  { %82 = vrot.lane.b32.xlu1 %v1049_v1, %s968_s29  ;;  %73 = vrot.lane.b32.xlu0 %v1049_v1, %s970_s18  ;;  %vm105_vm4 = vcmp.lt.s32.totalorder %v1117_v6, 127  ;;  %vm112_vm5 = vcmp.lt.s32.totalorder %v1117_v6, 113  ;;  %vm119_vm6 = vcmp.lt.s32.totalorder %v1117_v6, 112  ;;  %vm126_vm7 = vcmp.lt.s32.totalorder %v1117_v6, 111 }
  0x2f   :  { %239 = vrot.lane.b32.xlu1 %v1055_v2, %s970_s18  ;;  %237 = vrot.lane.b32.xlu0 %v1057_v3, %s970_s18 }
  0x33   :  { %245 = vrot.lane.b32.xlu1 %v1055_v2, %s968_s29  ;;  %243 = vrot.lane.b32.xlu0 %v1057_v3, %s968_s29 }
  0x37   :  { %89 = vrot.lane.b32.xlu1 %v1049_v1, %s971_s4  ;;  %87 = vrot.lane.b32.xlu0 %v1043_v0, %s971_s4 }
  0x3b   :  { %96 = vrot.lane.b32.xlu1 %v1049_v1, %s972_s19  ;;  %94 = vrot.lane.b32.xlu0 %v1043_v0, %s972_s19 }
  0x3f   :  { %251 = vrot.lane.b32.xlu1 %v1055_v2, %s971_s4  ;;  %249 = vrot.lane.b32.xlu0 %v1057_v3, %s971_s4 }
  0x43   :  { %257 = vrot.lane.b32.xlu1 %v1055_v2, %s972_s19  ;;  %255 = vrot.lane.b32.xlu0 %v1057_v3, %s972_s19 }
  0x47   :  { %103 = vrot.lane.b32.xlu1 %v1049_v1, %s973_s20  ;;  %101 = vrot.lane.b32.xlu0 %v1043_v0, %s973_s20 }
  0x4b   :  { %263 = vrot.lane.b32.xlu1 %v1055_v2, %s973_s20  ;;  %261 = vrot.lane.b32.xlu0 %v1057_v3, %s973_s20 }
  0x4f   :  { %110 = vrot.lane.b32.xlu1 %v1049_v1, %s974_s21  ;;  %108 = vrot.lane.b32.xlu0 %v1043_v0, %s974_s21 }
  0x53   :  { %117 = vrot.lane.b32.xlu1 %v1049_v1, %s975_s22  ;;  %115 = vrot.lane.b32.xlu0 %v1043_v0, %s975_s22 }
  0x57   :  { %269 = vrot.lane.b32.xlu1 %v1055_v2, %s974_s21  ;;  %267 = vrot.lane.b32.xlu0 %v1057_v3, %s974_s21 }
  0x5b   :  { %275 = vrot.lane.b32.xlu1 %v1055_v2, %s975_s22  ;;  %273 = vrot.lane.b32.xlu0 %v1057_v3, %s975_s22 }
  0x5f   :  { %124 = vrot.lane.b32.xlu1 %v1049_v1, %s977_s23  ;;  %122 = vrot.lane.b32.xlu0 %v1043_v0, %s977_s23 }
  0x63   :  { %281 = vrot.lane.b32.xlu1 %v1055_v2, %s977_s23  ;;  %279 = vrot.lane.b32.xlu0 %v1057_v3, %s977_s23 }
  0x99   :  { %v81_v7 = vpop.permute.xlu1 %80  ;;  %v72_v8 = vpop.permute.xlu0 %71 }
  0x9d   :  { %v83_v13 = vpop.permute.xlu1 %82  ;;  %v74_v14 = vpop.permute.xlu0 %73 }
  0x9e   :  { %v85_v15 = vsel %vm84_vm0, %v81_v7, %v83_v13  ;;  %v86_v16 = vsel %vm84_vm0, %v83_v13, %v81_v7  ;;  %v78_v17 = vsel %vm77_vm1, %v72_v8, %v74_v14  ;;  %v79_v18 = vsel %vm77_vm1, %v74_v14, %v72_v8  ;;  %v1184_v7 = vld [vmem:[#allocation7 + $0x48] sm:$0xff]  ;;  %v1186_v8 = vld [vmem:[#allocation7 + $0x40] sm:$0xff] }
  0x9f   :  { %v131_v19 = vmul.f32 %v86_v16, %v1120_v9  ;;  %v129_v20 = vmul.f32 %v79_v18, %v1123_v10  ;;  %v130_v21 = vmul.f32 %v78_v17, %v1125_v11  ;;  %v132_v22 = vmul.f32 %v85_v15, %v1127_v12  ;;  %v1192_v17 = vld [vmem:[#allocation7 + $0x50] sm:$0xff]  ;;  %v1194_v18 = vld [vmem:[#allocation7 + $0x58] sm:$0xff] }
  0xa1   :  { %v240_v23 = vpop.permute.xlu1 %239  ;;  %v238_v24 = vpop.permute.xlu0 %237  ;;  %v804_v25 = vpack.c.bf16 %v132_v22, %v130_v21  ;;  %v806_v26 = vpack.c.bf16 %v131_v19, %v129_v20 }
  0xa2   :  { %v241_v27 = vsel %vm77_vm1, %v238_v24, %v240_v23  ;;  %v242_v28 = vsel %vm77_vm1, %v240_v23, %v238_v24  ;;  %v138_v23 = vmul.f32 %v1049_v1, %v1184_v7  ;;  %v137_v24 = vmul.f32 %v1043_v0, %v1186_v8 }
  0xa3   :  { %805 = vmatprep.subr.bf16.mxu0 %v804_v25  ;;  %v285_v33 = vmul.f32 %v242_v28, %v1123_v10  ;;  %v286_v35 = vmul.f32 %v241_v27, %v1125_v11 }
  0xa4   :  { %807 = vmatpush1.bf16.msra.mxu0 %v806_v26 }
  0xa5   :  { %v246_v29 = vpop.permute.xlu1 %245  ;;  %v244_v30 = vpop.permute.xlu0 %243 }
  0xa6   :  { %v247_v31 = vsel %vm84_vm0, %v244_v30, %v246_v29  ;;  %v248_v32 = vsel %vm84_vm0, %v246_v29, %v244_v30 }
  0xa7   :  { %v287_v34 = vmul.f32 %v248_v32, %v1120_v9  ;;  %v288_v36 = vmul.f32 %v247_v31, %v1127_v12 }
  0xa9   :  { %v90_v37 = vpop.permute.xlu1 %89  ;;  %v88_v38 = vpop.permute.xlu0 %87  ;;  %v820_v39 = vpack.c.bf16 %v288_v36, %v286_v35  ;;  %v822_v40 = vpack.c.bf16 %v287_v34, %v285_v33  ;;  %v294_v33 = vmul.f32 %v1055_v2, %v1184_v7  ;;  %v293_v34 = vmul.f32 %v1057_v3, %v1186_v8 }
  0xaa   :  { %v92_v43 = vsel %vm91_vm2, %v88_v38, %v90_v37  ;;  %v93_v44 = vsel %vm91_vm2, %v90_v37, %v88_v38 }
  0xab   :  { %821 = vmatprep.subr.bf16.mxu1 %v820_v39  ;;  %v133_v51 = vmul.f32 %v93_v44, %v1154_v41  ;;  %v134_v52 = vmul.f32 %v92_v43, %v1157_v42 }
  0xac   :  { %823 = vmatpush1.bf16.msra.mxu1 %v822_v40 }
  0xad   :  { %v97_v47 = vpop.permute.xlu1 %96  ;;  %v95_v48 = vpop.permute.xlu0 %94 }
  0xae   :  { %v99_v49 = vsel %vm98_vm3, %v95_v48, %v97_v47  ;;  %v100_v50 = vsel %vm98_vm3, %v97_v47, %v95_v48  ;;  %v1217_v47 = vld [vmem:[#allocation7 + $0x60] sm:$0xff]  ;;  %v1220_v48 = vld [vmem:[#allocation7 + $0x68] sm:$0xff] }
  0xaf   :  { %v135_v53 = vmul.f32 %v100_v50, %v1163_v45  ;;  %v136_v54 = vmul.f32 %v99_v49, %v1165_v46 }
  0xb1   :  { %v252_v55 = vpop.permute.xlu1 %251  ;;  %v250_v56 = vpop.permute.xlu0 %249  ;;  %v808_v57 = vpack.c.bf16 %v136_v54, %v134_v52  ;;  %v810_v58 = vpack.c.bf16 %v135_v53, %v133_v51  ;;  %v1226_v51 = vld [vmem:[#allocation7 + $0x70] sm:$0xff]  ;;  %v1228_v52 = vld [vmem:[#allocation7 + $0x78] sm:$0xff] }
  0xb2   :  { %v253_v59 = vsel %vm91_vm2, %v250_v56, %v252_v55  ;;  %v254_v60 = vsel %vm91_vm2, %v252_v55, %v250_v56 }
  0xb3   :  { %809 = vmatprep.subr.bf16.mxu0 %v808_v57  ;;  %v289_v13 = vmul.f32 %v254_v60, %v1154_v41  ;;  %v290_v14 = vmul.f32 %v253_v59, %v1157_v42 }
  0xb4   :  { %811 = vmatpush1.bf16.msra.mxu0 %v810_v58 }
  0xb5   :  { %v258_v61 = vpop.permute.xlu1 %257  ;;  %v256_v62 = vpop.permute.xlu0 %255 }
  0xb6   :  { %v259_v63 = vsel %vm98_vm3, %v256_v62, %v258_v61  ;;  %v260_v5 = vsel %vm98_vm3, %v258_v61, %v256_v62 }
  0xb7   :  { %v291_v15 = vmul.f32 %v260_v5, %v1163_v45  ;;  %v292_v16 = vmul.f32 %v259_v63, %v1165_v46 }
  0xb9   :  { %v104_v19 = vpop.permute.xlu1 %103  ;;  %v102_v20 = vpop.permute.xlu0 %101  ;;  %v824_v21 = vpack.c.bf16 %v292_v16, %v290_v14  ;;  %v826_v22 = vpack.c.bf16 %v291_v15, %v289_v13 }
  0xba   :  { %v106_v25 = vsel %vm105_vm4, %v102_v20, %v104_v19  ;;  %v107_v26 = vsel %vm105_vm4, %v104_v19, %v102_v20 }
  0xbb   :  { %v139_v27 = vmul.f32 %v106_v25, %v1192_v17  ;;  %v140_v28 = vmul.f32 %v107_v26, %v1194_v18  ;;  %825 = vmatprep.subr.bf16.mxu1 %v824_v21  ;;  %v1251_v25 = vld [vmem:[#allocation7 + $0x80] sm:$0xff]  ;;  %v1253_v26 = vld [vmem:[#allocation7 + $0x88] sm:$0xff] }
  0xbc   :  { %827 = vmatpush1.bf16.msra.mxu1 %v826_v22 }
  0xbd   :  { %v264_v29 = vpop.permute.xlu1 %263  ;;  %v262_v30 = vpop.permute.xlu0 %261  ;;  %v812_v31 = vpack.c.bf16 %v140_v28, %v138_v23  ;;  %v814_v32 = vpack.c.bf16 %v139_v27, %v137_v24 }
  0xbe   :  { %v265_v35 = vsel %vm105_vm4, %v262_v30, %v264_v29  ;;  %v266_v36 = vsel %vm105_vm4, %v264_v29, %v262_v30 }
  0xbf   :  { %v295_v37 = vmul.f32 %v265_v35, %v1192_v17  ;;  %v296_v38 = vmul.f32 %v266_v36, %v1194_v18  ;;  %813 = vmatprep.subr.bf16.mxu0 %v812_v31  ;;  %v49_v35 = vld [vmem:[%s1486_s1] sm:$0xff] }
  0xc0   :  { %815 = vmatpush1.bf16.msra.mxu0 %v814_v32 }
  0xc1   :  { %v111_v39 = vpop.permute.xlu1 %110  ;;  %v109_v40 = vpop.permute.xlu0 %108  ;;  %v828_v43 = vpack.c.bf16 %v296_v38, %v294_v33  ;;  %v830_v44 = vpack.c.bf16 %v295_v37, %v293_v34 }
  0xc2   :  { %v113_v49 = vsel %vm112_vm5, %v109_v40, %v111_v39  ;;  %v114_v50 = vsel %vm112_vm5, %v111_v39, %v109_v40 }
  0xc3   :  { %829 = vmatprep.subr.bf16.mxu1 %v828_v43  ;;  %v141_v57 = vmul.f32 %v113_v49, %v1217_v47  ;;  %v142_v58 = vmul.f32 %v114_v50, %v1220_v48 }
  0xc4   :  { %831 = vmatpush1.bf16.msra.mxu1 %v830_v44 }
  0xc5   :  { %v118_v53 = vpop.permute.xlu1 %117  ;;  %v116_v54 = vpop.permute.xlu0 %115 }
  0xc6   :  { %v120_v55 = vsel %vm119_vm6, %v116_v54, %v118_v53  ;;  %v121_v56 = vsel %vm119_vm6, %v118_v53, %v116_v54 }
  0xc7   :  { %v143_v59 = vmul.f32 %v120_v55, %v1226_v51  ;;  %v144_v60 = vmul.f32 %v121_v56, %v1228_v52 }
  0xc9   :  { %v270_v61 = vpop.permute.xlu1 %269  ;;  %v268_v62 = vpop.permute.xlu0 %267  ;;  %v816_v63 = vpack.c.bf16 %v144_v60, %v142_v58  ;;  %v818_v5 = vpack.c.bf16 %v143_v59, %v141_v57 }
  0xca   :  { %v271_v13 = vsel %vm112_vm5, %v268_v62, %v270_v61  ;;  %v272_v14 = vsel %vm112_vm5, %v270_v61, %v268_v62  ;;  %v978_v62 = vmov 0  }
  0xcb   :  { %817 = vmatprep.subr.bf16.mxu0 %v816_v63  ;;  %v297_v21 = vmul.f32 %v271_v13, %v1217_v47  ;;  %v298_v22 = vmul.f32 %v272_v14, %v1220_v48  ;;  %885 = vset.pattern.permute.xlu0 %v978_v62 }
  0xcc   :  { %819 = vmatpush1.bf16.msra.mxu0 %v818_v5 }
  0xcd   :  { %v276_v15 = vpop.permute.xlu1 %275  ;;  %v274_v16 = vpop.permute.xlu0 %273 }
  0xce   :  { %v277_v19 = vsel %vm119_vm6, %v274_v16, %v276_v15  ;;  %v278_v20 = vsel %vm119_vm6, %v276_v15, %v274_v16 }
  0xcf   :  { %v299_v23 = vmul.f32 %v277_v19, %v1226_v51  ;;  %v300_v24 = vmul.f32 %v278_v20, %v1228_v52 }
  0xd1   :  { %v125_v27 = vpop.permute.xlu1 %124  ;;  %v123_v28 = vpop.permute.xlu0 %122  ;;  %v832_v29 = vpack.c.bf16 %v300_v24, %v298_v22  ;;  %v834_v30 = vpack.c.bf16 %v299_v23, %v297_v21  ;;  %v979_v23 = vmov 1   ;;  %v1277_v24 = vld [vmem:[%s1488_s3] sm:$0xff] }
  0xd2   :  { %v127_v31 = vsel %vm126_vm7, %v123_v28, %v125_v27  ;;  %v128_v32 = vsel %vm126_vm7, %v125_v27, %v123_v28  ;;  %886 = vset.pattern.permute.xlu1 %v979_v23 }
  0xd3   :  { %v145_v33 = vmul.f32 %v127_v31, %v1251_v25  ;;  %v146_v34 = vmul.f32 %v128_v32, %v1253_v26  ;;  %833 = vmatprep.subr.bf16.mxu1 %v832_v29 }
  0xd4   :  { %835 = vmatpush1.bf16.msra.mxu1 %v834_v30 }
  0xd5   :  { %v282_v36 = vpop.permute.xlu1 %281  ;;  %v280_v37 = vpop.permute.xlu0 %279  ;;  %167 = vmatprep.subr.mxu0 %v146_v34 }
  0xd6   :  { %v283_v38 = vsel %vm126_vm7, %v280_v37, %v282_v36  ;;  %v284_v39 = vsel %vm126_vm7, %v282_v36, %v280_v37  ;;  %168 = vmatpush1.msra.mxu0 %v145_v33 }
  0xd7   :  { %v301_v40 = vmul.f32 %v283_v38, %v1251_v25  ;;  %v302_v43 = vmul.f32 %v284_v39, %v1253_v26  ;;  %800 = vmatmul.mubr.msk.f32.vlgmr.msra.gmra.mrb[0].mxu0 %vm147_vm8, %v49_v35 }
  0xd8   :  { %552 = vmatprep.mubr.f32.mxu0 %v976_v4 }
  0xd9   :  { %319 = vmatprep.subr.mxu1 %v302_v43 }
  0xda   :  { %320 = vmatpush1.msra.mxu1 %v301_v40 }
  0xdb   :  { %801 = vmatmul.mubr.msk.f32.vlgmr.msra.gmra.mrb[0].mxu1 %vm147_vm8, %v49_v35 }
  0xdc   :  { %709 = vmatprep.mubr.f32.mxu1 %v976_v4 }
 0x1aa   :  { %v217_v44 = vpop.f32.mrb[0].mxu0 }
 0x1ab   :  { %v219_v49 = vpop.f32.mrb[1].mxu0  ;;  %v228_v50 = vmul.f32 %v217_v44, %v217_v44 }
 0x1ac   :  { %v224_v53 = vadd.f32 %v219_v49, %v217_v44  ;;  %v229_v54 = vmul.f32 %v219_v49, %v219_v49 }
 0x1ae   :  { %v369_v55 = vpop.f32.mrb[0].mxu1  ;;  %225 = vadd.xlane.f32.xlu0 %v224_v53  ;;  %v230_v56 = vadd.f32 %v229_v54, %v228_v50 }
 0x1af   :  { %v371_v57 = vpop.f32.mrb[1].mxu1  ;;  %v381_v58 = vmul.f32 %v369_v55, %v369_v55 }
 0x1b0   :  { %v377_v59 = vadd.f32 %v371_v57, %v369_v55  ;;  %v382_v60 = vmul.f32 %v371_v57, %v371_v57 }
 0x1b2   :  { %378 = vadd.xlane.f32.xlu1 %v377_v59  ;;  %231 = vadd.xlane.f32.xlu0 %v230_v56  ;;  %v383_v61 = vadd.f32 %v382_v60, %v381_v58 }
 0x1b6   :  { %384 = vadd.xlane.f32.xlu0 %v383_v61 }
 0x23b   :  { %v226_v63 = vpop.xlane.xlu0 %225 }
 0x23f   :  { %v379_v4 = vpop.xlane.xlu1 %378  ;;  %v232_v5 = vpop.xlane.xlu0 %231 }
 0x240   :  { %v380_v13 = vadd.f32 %v379_v4, %v226_v63 }
 0x242   :  { %v388_v14 = vmul.f32 0.001953125, %v380_v13 }
 0x243   :  { %v385_v15 = vpop.xlane.xlu0 %384 }
 0x244   :  { %v386_v16 = vadd.f32 %v385_v15, %v232_v5  ;;  %v390_v19 = vmul.f32 %v388_v14, %v388_v14 }
 0x246   :  { %v389_v20 = vmul.f32 0.001953125, %v386_v16 }
 0x248   :  { %v391_v21 = vsub.f32 %v389_v20, %v390_v19 }
 0x24a   :  { %v392_v22 = vadd.f32 1e-05, %v391_v21 }
 0x24c   :  { %890 = vrsqrt.f32 %v392_v22 }
 0x256   :  { %v891_v27 = vpop.eup %890 }
 0x257   :  { %v394_v28 = vmul.f32 %v891_v27, %v1277_v24 }
 0x259   :  { %405 = vperm.xlu0 %885, %v394_v28   ;;  %v395_v29 = vmul.f32 %v394_v28, %v388_v14 }
 0x25b   :  { %397 = vrot.lane.b32.xlu1 %v395_v29, %s972_s19 }
 0x2cd   :  { %v398_v30 = vpop.permute.xlu1 %397 }
 0x2ce   :  { %v400_v31 = vsub.f32 %v1277_v24, %v398_v30 }
 0x2d0   :  { %412 = vperm.xlu1 %886, %v400_v31  }
 0x2d8   :  { %v406_v32 = vpop.permute.xlu0 %405 }
 0x2d9   :  { %v408_v33 = vmul.f32 %v406_v32, %v217_v44  ;;  %v574_v34 = vmul.f32 %v406_v32, %v371_v57  ;;  %v409_v36 = vmul.f32 %v406_v32, %v219_v49  ;;  %v573_v44 = vmul.f32 %v406_v32, %v369_v55 }
 0x34f   :  { %v413_v35 = vpop.permute.xlu1 %412 }
 0x350   :  { %v415_v37 = vadd.f32 %v413_v35, %v408_v33  ;;  %v576_v38 = vadd.f32 %v574_v34, %v413_v35  ;;  %v416_v39 = vadd.f32 %v413_v35, %v409_v36  ;;  %v575_v49 = vadd.f32 %v573_v44, %v413_v35 }
 0x352   :  { %v1282_v40 = vmax.f32 %v415_v37, 0.0  ;;  %v1284_v43 = vmax.f32 %v576_v38, 0.0  ;;  %v1290_v50 = vmax.f32 %v416_v39, 0.0  ;;  %v1304_v53 = vmax.f32 %v575_v49, 0.0 }
 0x354   :  { %419 = vrot.lane.b32.xlu1 %v1282_v40, %s970_s18  ;;  %587 = vrot.lane.b32.xlu0 %v1284_v43, %s968_s29 }
 0x358   :  { %421 = vrot.lane.b32.xlu1 %v1290_v50, %s970_s18  ;;  %433 = vrot.lane.b32.xlu0 %v1290_v50, %s971_s4 }
 0x35c   :  { %425 = vrot.lane.b32.xlu1 %v1282_v40, %s968_s29  ;;  %439 = vrot.lane.b32.xlu0 %v1290_v50, %s972_s19 }
 0x360   :  { %427 = vrot.lane.b32.xlu1 %v1290_v50, %s968_s29  ;;  %593 = vrot.lane.b32.xlu0 %v1284_v43, %s971_s4 }
 0x364   :  { %599 = vrot.lane.b32.xlu0 %v1284_v43, %s972_s19  ;;  %579 = vrot.lane.b32.xlu1 %v1304_v53, %s970_s18 }
 0x368   :  { %445 = vrot.lane.b32.xlu0 %v1290_v50, %s973_s20  ;;  %581 = vrot.lane.b32.xlu1 %v1284_v43, %s970_s18 }
 0x36c   :  { %605 = vrot.lane.b32.xlu0 %v1284_v43, %s973_s20  ;;  %585 = vrot.lane.b32.xlu1 %v1304_v53, %s968_s29 }
 0x370   :  { %451 = vrot.lane.b32.xlu0 %v1290_v50, %s974_s21  ;;  %431 = vrot.lane.b32.xlu1 %v1282_v40, %s971_s4 }
 0x374   :  { %457 = vrot.lane.b32.xlu0 %v1290_v50, %s975_s22  ;;  %437 = vrot.lane.b32.xlu1 %v1282_v40, %s972_s19 }
 0x378   :  { %611 = vrot.lane.b32.xlu0 %v1284_v43, %s974_s21  ;;  %591 = vrot.lane.b32.xlu1 %v1304_v53, %s971_s4 }
 0x37c   :  { %617 = vrot.lane.b32.xlu0 %v1284_v43, %s975_s22  ;;  %597 = vrot.lane.b32.xlu1 %v1304_v53, %s972_s19 }
 0x380   :  { %463 = vrot.lane.b32.xlu0 %v1290_v50, %s977_s23  ;;  %443 = vrot.lane.b32.xlu1 %v1282_v40, %s973_s20 }
 0x384   :  { %623 = vrot.lane.b32.xlu0 %v1284_v43, %s977_s23  ;;  %603 = vrot.lane.b32.xlu1 %v1304_v53, %s973_s20 }
 0x388   :  { %449 = vrot.lane.b32.xlu1 %v1282_v40, %s974_s21 }
 0x38c   :  { %455 = vrot.lane.b32.xlu1 %v1282_v40, %s975_s22 }
 0x390   :  { %609 = vrot.lane.b32.xlu1 %v1304_v53, %s974_s21 }
 0x394   :  { %615 = vrot.lane.b32.xlu1 %v1304_v53, %s975_s22 }
 0x398   :  { %461 = vrot.lane.b32.xlu1 %v1282_v40, %s977_s23 }
 0x39c   :  { %621 = vrot.lane.b32.xlu1 %v1304_v53, %s977_s23 }
 0x3c6   :  { %v420_v54 = vpop.permute.xlu1 %419  ;;  %v588_v55 = vpop.permute.xlu0 %587 }
 0x3ca   :  { %v422_v56 = vpop.permute.xlu1 %421  ;;  %v434_v57 = vpop.permute.xlu0 %433 }
 0x3cb   :  { %v423_v59 = vsel %vm77_vm1, %v420_v54, %v422_v56  ;;  %v424_v60 = vsel %vm77_vm1, %v422_v56, %v420_v54 }
 0x3cc   :  { %v467_v5 = vmul.f32 %v424_v60, %v1123_v10  ;;  %v468_v13 = vmul.f32 %v423_v59, %v1125_v11 }
 0x3ce   :  { %v426_v58 = vpop.permute.xlu1 %425  ;;  %v440_v61 = vpop.permute.xlu0 %439 }
 0x3d2   :  { %v428_v62 = vpop.permute.xlu1 %427  ;;  %v594_v21 = vpop.permute.xlu0 %593 }
 0x3d3   :  { %v429_v63 = vsel %vm84_vm0, %v426_v58, %v428_v62  ;;  %v430_v4 = vsel %vm84_vm0, %v428_v62, %v426_v58 }
 0x3d4   :  { %v469_v14 = vmul.f32 %v430_v4, %v1120_v9  ;;  %v470_v15 = vmul.f32 %v429_v63, %v1127_v12 }
 0x3d6   :  { %v838_v16 = vpack.c.bf16 %v469_v14, %v467_v5  ;;  %v580_v19 = vpop.permute.xlu1 %579  ;;  %v836_v20 = vpack.c.bf16 %v470_v15, %v468_v13  ;;  %v600_v28 = vpop.permute.xlu0 %599 }
 0x3d8   :  { %837 = vmatprep.subr.bf16.mxu0 %v836_v20 }
 0x3d9   :  { %839 = vmatpush1.bf16.msra.mxu0 %v838_v16 }
 0x3da   :  { %v582_v22 = vpop.permute.xlu1 %581  ;;  %v446_v39 = vpop.permute.xlu0 %445 }
 0x3db   :  { %v583_v23 = vsel %vm77_vm1, %v580_v19, %v582_v22  ;;  %v584_v27 = vsel %vm77_vm1, %v582_v22, %v580_v19 }
 0x3dc   :  { %v627_v32 = vmul.f32 %v584_v27, %v1123_v10  ;;  %v628_v33 = vmul.f32 %v583_v23, %v1125_v11 }
 0x3de   :  { %v586_v29 = vpop.permute.xlu1 %585  ;;  %v606_v58 = vpop.permute.xlu0 %605 }
 0x3df   :  { %v589_v30 = vsel %vm84_vm0, %v586_v29, %v588_v55  ;;  %v590_v31 = vsel %vm84_vm0, %v588_v55, %v586_v29 }
 0x3e0   :  { %v629_v34 = vmul.f32 %v590_v31, %v1120_v9  ;;  %v630_v35 = vmul.f32 %v589_v30, %v1127_v12 }
 0x3e2   :  { %v854_v36 = vpack.c.bf16 %v629_v34, %v627_v32  ;;  %v432_v37 = vpop.permute.xlu1 %431  ;;  %v852_v38 = vpack.c.bf16 %v630_v35, %v628_v33  ;;  %v452_v13 = vpop.permute.xlu0 %451 }
 0x3e3   :  { %v435_v44 = vsel %vm91_vm2, %v432_v37, %v434_v57  ;;  %v436_v49 = vsel %vm91_vm2, %v434_v57, %v432_v37 }
 0x3e4   :  { %853 = vmatprep.subr.bf16.mxu1 %v852_v38  ;;  %v471_v11 = vmul.f32 %v436_v49, %v1154_v41  ;;  %v472_v12 = vmul.f32 %v435_v44, %v1157_v42 }
 0x3e5   :  { %855 = vmatpush1.bf16.msra.mxu1 %v854_v36 }
 0x3e6   :  { %v438_v54 = vpop.permute.xlu1 %437 }
 0x3e7   :  { %v441_v10 = vsel %vm98_vm3, %v438_v54, %v440_v61  ;;  %v442_v9 = vsel %vm98_vm3, %v440_v61, %v438_v54 }
 0x3e8   :  { %v473_v55 = vmul.f32 %v442_v9, %v1163_v45  ;;  %v474_v56 = vmul.f32 %v441_v10, %v1165_v46 }
 0x3ea   :  { %v842_v59 = vpack.c.bf16 %v473_v55, %v471_v11  ;;  %v592_v60 = vpop.permute.xlu1 %591  ;;  %v840_v57 = vpack.c.bf16 %v474_v56, %v472_v12 }
 0x3eb   :  { %v595_v62 = vsel %vm91_vm2, %v592_v60, %v594_v21  ;;  %v596_v63 = vsel %vm91_vm2, %v594_v21, %v592_v60 }
 0x3ec   :  { %841 = vmatprep.subr.bf16.mxu0 %v840_v57  ;;  %v631_v14 = vmul.f32 %v596_v63, %v1154_v41  ;;  %v632_v15 = vmul.f32 %v595_v62, %v1157_v42 }
 0x3ed   :  { %843 = vmatpush1.bf16.msra.mxu0 %v842_v59 }
 0x3ee   :  { %v598_v61 = vpop.permute.xlu1 %597 }
 0x3ef   :  { %v601_v4 = vsel %vm98_vm3, %v598_v61, %v600_v28  ;;  %v602_v5 = vsel %vm98_vm3, %v600_v28, %v598_v61  ;;  %v475_v28 = vmul.f32 %v1282_v40, %v1186_v8  ;;  %v635_v40 = vmul.f32 %v1304_v53, %v1186_v8 }
 0x3f0   :  { %v633_v16 = vmul.f32 %v602_v5, %v1163_v45  ;;  %v634_v19 = vmul.f32 %v601_v4, %v1165_v46  ;;  %v476_v45 = vmul.f32 %v1290_v50, %v1184_v7  ;;  %v458_v46 = vpop.permute.xlu0 %457  ;;  %v636_v50 = vmul.f32 %v1284_v43, %v1184_v7 }
 0x3f2   :  { %v858_v20 = vpack.c.bf16 %v633_v16, %v631_v14  ;;  %v444_v22 = vpop.permute.xlu1 %443  ;;  %v856_v21 = vpack.c.bf16 %v634_v19, %v632_v15 }
 0x3f3   :  { %v447_v23 = vsel %vm105_vm4, %v444_v22, %v446_v39  ;;  %v448_v27 = vsel %vm105_vm4, %v446_v39, %v444_v22 }
 0x3f4   :  { %v477_v41 = vmul.f32 %v447_v23, %v1192_v17  ;;  %v478_v42 = vmul.f32 %v448_v27, %v1194_v18  ;;  %857 = vmatprep.subr.bf16.mxu1 %v856_v21  ;;  %v612_v39 = vpop.permute.xlu0 %611 }
 0x3f5   :  { %859 = vmatpush1.bf16.msra.mxu1 %v858_v20 }
 0x3f6   :  { %v846_v29 = vpack.c.bf16 %v477_v41, %v475_v28  ;;  %v604_v30 = vpop.permute.xlu1 %603  ;;  %v844_v31 = vpack.c.bf16 %v478_v42, %v476_v45 }
 0x3f7   :  { %v607_v32 = vsel %vm105_vm4, %v604_v30, %v606_v58  ;;  %v608_v33 = vsel %vm105_vm4, %v606_v58, %v604_v30 }
 0x3f8   :  { %v637_v34 = vmul.f32 %v607_v32, %v1192_v17  ;;  %v638_v35 = vmul.f32 %v608_v33, %v1194_v18  ;;  %845 = vmatprep.subr.bf16.mxu0 %v844_v31  ;;  %v618_v10 = vpop.permute.xlu0 %617  ;;  %v980_v32 = vmov 2  }
 0x3f9   :  { %847 = vmatpush1.bf16.msra.mxu0 %v846_v29  ;;  %887 = vset.pattern.permute.xlu1 %v980_v32 }
 0x3fa   :  { %v862_v36 = vpack.c.bf16 %v637_v34, %v635_v40  ;;  %v450_v37 = vpop.permute.xlu1 %449  ;;  %v860_v38 = vpack.c.bf16 %v638_v35, %v636_v50 }
 0x3fb   :  { %v453_v44 = vsel %vm112_vm5, %v450_v37, %v452_v13  ;;  %v454_v8 = vsel %vm112_vm5, %v452_v13, %v450_v37 }
 0x3fc   :  { %861 = vmatprep.subr.bf16.mxu1 %v860_v38  ;;  %v479_v43 = vmul.f32 %v453_v44, %v1217_v47  ;;  %v480_v53 = vmul.f32 %v454_v8, %v1220_v48  ;;  %v464_v57 = vpop.permute.xlu0 %463 }
 0x3fd   :  { %863 = vmatpush1.bf16.msra.mxu1 %v862_v36 }
 0x3fe   :  { %v456_v17 = vpop.permute.xlu1 %455 }
 0x3ff   :  { %v459_v18 = vsel %vm119_vm6, %v456_v17, %v458_v46  ;;  %v460_v7 = vsel %vm119_vm6, %v458_v46, %v456_v17  ;;  %v981_v17 = vmov 3  }
 0x400   :  { %v481_v49 = vmul.f32 %v459_v18, %v1226_v51  ;;  %v482_v54 = vmul.f32 %v460_v7, %v1228_v52  ;;  %889 = vset.pattern.permute.xlu0 %v981_v17 }
 0x402   :  { %v850_v9 = vpack.c.bf16 %v481_v49, %v479_v43  ;;  %v610_v11 = vpop.permute.xlu1 %609  ;;  %v848_v12 = vpack.c.bf16 %v482_v54, %v480_v53 }
 0x403   :  { %v613_v55 = vsel %vm112_vm5, %v610_v11, %v612_v39  ;;  %v614_v56 = vsel %vm112_vm5, %v612_v39, %v610_v11 }
 0x404   :  { %849 = vmatprep.subr.bf16.mxu0 %v848_v12  ;;  %v639_v62 = vmul.f32 %v613_v55, %v1217_v47  ;;  %v640_v63 = vmul.f32 %v614_v56, %v1220_v48  ;;  %v50_v47 = vld [vmem:[%s1487_s2] sm:$0xff]  ;;  %v624_v48 = vpop.permute.xlu0 %623  ;;  %s982_s2 = smov [#allocation9]  }
 0x405   :  { %851 = vmatpush1.bf16.msra.mxu0 %v850_v9  ;;  %s787_s30 = sshll.u32 %s982_s2, 4  ;;  %s788_s30 = int_to_ptr.vmem [resolvable:$true] %s787_s30 }
 0x406   :  { %v616_v58 = vpop.permute.xlu1 %615  ;;  %s938_s6 = scalar_lea.vmem %s788_s30, 512  ;;  %p943_p3 = scmp.lt.s32.totalorder %s788_s30, %s788_s30 }
 0x407   :  { %v619_v59 = vsel %vm119_vm6, %v616_v58, %v618_v10  ;;  %v620_v60 = vsel %vm119_vm6, %v618_v10, %v616_v58  ;;  %p939_p2 = scmp.ne.s32.totalorder %s788_s30, %s938_s6  ;;  %p944_p4 = scmp.lt.s32.totalorder %s938_s6, %s938_s6 }
 0x408   :  { %v641_v61 = vmul.f32 %v619_v59, %v1226_v51  ;;  %v642_v4 = vmul.f32 %v620_v60, %v1228_v52 }
 0x409   :  { %p945_p5 = por %p944_p4, %p943_p3 }
 0x40a   :  { %v866_v5 = vpack.c.bf16 %v641_v61, %v639_v62  ;;  %v462_v13 = vpop.permute.xlu1 %461  ;;  %v864_v14 = vpack.c.bf16 %v642_v4, %v640_v63 }
 0x40b   :  { %v465_v15 = vsel %vm126_vm7, %v462_v13, %v464_v57  ;;  %v466_v16 = vsel %vm126_vm7, %v464_v57, %v462_v13  ;;  %p946_p6 = pnand %p945_p5, %p939_p2 }
 0x40c   :  { %v483_v19 = vmul.f32 %v465_v15, %v1251_v25  ;;  %v484_v20 = vmul.f32 %v466_v16, %v1253_v26  ;;  %865 = vmatprep.subr.bf16.mxu1 %v864_v14 }
 0x40d   :  { %867 = vmatpush1.bf16.msra.mxu1 %v866_v5 }
 0x40e   :  { %504 = vmatprep.subr.mxu0 %v484_v20  ;;  %v622_v51 = vpop.permute.xlu1 %621 }
 0x40f   :  { %v625_v52 = vsel %vm126_vm7, %v622_v51, %v624_v48  ;;  %v626_v22 = vsel %vm126_vm7, %v624_v48, %v622_v51  ;;  %505 = vmatpush1.msra.mxu0 %v483_v19 }
 0x410   :  { %v643_v21 = vmul.f32 %v625_v52, %v1251_v25  ;;  %v644_v23 = vmul.f32 %v626_v22, %v1253_v26  ;;  %802 = vmatmul.mubr.msk.f32.vlgmr.msra.gmra.mrb[2].mxu0 %vm147_vm8, %v50_v47 }
 0x412   :  { %661 = vmatprep.subr.mxu1 %v644_v23 }
 0x413   :  { %662 = vmatpush1.msra.mxu1 %v643_v21 }
 0x414   :  { %803 = vmatmul.mubr.msk.f32.vlgmr.msra.gmra.mrb[2].mxu1 %vm147_vm8, %v50_v47 }
 0x4e3   :  { %v554_v27 = vpop.f32.mrb[2].mxu0 }
 0x4e4   :  { %v556_v28 = vpop.f32.mrb[3].mxu0  ;;  %v565_v41 = vmul.f32 %v554_v27, %v554_v27 }
 0x4e5   :  { %v566_v42 = vmul.f32 %v556_v28, %v556_v28  ;;  %v561_v45 = vadd.f32 %v556_v28, %v554_v27 }
 0x4e7   :  { %v711_v46 = vpop.f32.mrb[2].mxu1  ;;  %562 = vadd.xlane.f32.xlu1 %v561_v45  ;;  %v567_v6 = vadd.f32 %v566_v42, %v565_v41 }
 0x4e8   :  { %v713_v29 = vpop.f32.mrb[3].mxu1  ;;  %v723_v30 = vmul.f32 %v711_v46, %v711_v46 }
 0x4e9   :  { %v724_v31 = vmul.f32 %v713_v29, %v713_v29  ;;  %v719_v25 = vadd.f32 %v713_v29, %v711_v46 }
 0x4eb   :  { %720 = vadd.xlane.f32.xlu0 %v719_v25  ;;  %v725_v26 = vadd.f32 %v724_v31, %v723_v30 }
 0x4ed   :  { %726 = vadd.xlane.f32.xlu1 %v725_v26 }
 0x4ef   :  { %568 = vadd.xlane.f32.xlu0 %v567_v6 }
 0x574   :  { %v563_v33 = vpop.xlane.xlu1 %562 }
 0x578   :  { %v721_v40 = vpop.xlane.xlu0 %720 }
 0x579   :  { %v722_v34 = vadd.f32 %v721_v40, %v563_v33 }
 0x57a   :  { %v727_v50 = vpop.xlane.xlu1 %726 }
 0x57b   :  { %v730_v35 = vmul.f32 0.001953125, %v722_v34 }
 0x57c   :  { %v569_v36 = vpop.xlane.xlu0 %568 }
 0x57d   :  { %v728_v37 = vadd.f32 %v727_v50, %v569_v36  ;;  %v732_v38 = vmul.f32 %v730_v35, %v730_v35 }
 0x57f   :  { %v731_v39 = vmul.f32 0.001953125, %v728_v37 }
 0x581   :  { %v733_v44 = vsub.f32 %v731_v39, %v732_v38 }
 0x583   :  { %v734_v8 = vadd.f32 1e-05, %v733_v44 }
 0x585   :  { %892 = vrsqrt.f32 %v734_v8 }
 0x58f   :  { %v893_v18 = vpop.eup %892 }
 0x590   :  { %v736_v7 = vmul.f32 %v893_v18, %v1277_v24 }
 0x592   :  { %749 = vperm.xlu1 %887, %v736_v7   ;;  %v737_v43 = vmul.f32 %v736_v7, %v730_v35 }
 0x594   :  { %739 = vrot.lane.b32.xlu0 %v737_v43, %s972_s19 }
 0x596   :  { %888 = vset.pattern.permute.xlu1 %v981_v17 }
 0x606   :  { %v740_v53 = vpop.permute.xlu0 %739 }
 0x607   :  { %v742_v49 = vsub.f32 %v1277_v24, %v740_v53 }
 0x609   :  { %758 = vperm.xlu1 %888, %v742_v49  }
 0x611   :  { %v750_v54 = vpop.permute.xlu1 %749 }
 0x612   :  { %v752_v10 = vmul.f32 %v750_v54, %v554_v27  ;;  %v753_v9 = vmul.f32 %v750_v54, %v556_v28  ;;  %v771_v11 = vmul.f32 %v750_v54, %v711_v46  ;;  %v772_v12 = vmul.f32 %v750_v54, %v713_v29 }
 0x614   :  { %v754_v55 = vadd.f32 %v752_v10, %v1043_v0  ;;  %v755_v56 = vadd.f32 %v753_v9, %v1049_v1  ;;  %v773_v58 = vadd.f32 %v771_v11, %v1057_v3  ;;  %v774_v59 = vadd.f32 %v772_v12, %v1055_v2 }
 0x688   :  { %v759_v60 = vpop.permute.xlu1 %758 }
 0x689   :  { %v761_v57 = vadd.f32 %v759_v60, %v754_v55  ;;  %v762_v62 = vadd.f32 %v759_v60, %v755_v56  ;;  %v775_v24 = vadd.f32 %v773_v58, %v759_v60  ;;  %v776_v63 = vadd.f32 %v774_v59, %v759_v60 }
 0x68b   :  { %v763_v61 = vmax.f32 %v761_v57, 0.0  ;;  %v764_v4 = vmax.f32 %v762_v62, 0.0  ;;  %v777_v5 = vmax.f32 %v775_v24, 0.0  ;;  %v778_v13 = vmax.f32 %v776_v63, 0.0 }
 0x68d   :  { %765 = vst [vmem:[#allocation9] sm:$0xff] %v763_v61  ;;  %766 = vst [vmem:[#allocation9 + $0x8] sm:$0xff] %v764_v4 }
 0x68e   :  { %780 = vst [vmem:[#allocation9 + $0x10] sm:$0xff] %v777_v5  ;;  %781 = vst [vmem:[#allocation9 + $0x18] sm:$0xff] %v778_v13 }
 0x68f   :  { %949 = shalt.err (!%p946_p6)
}
 0x690   :  { %s950_s9 = scalar_lea.hbm %s1490_s5, 512 }
 0x691   :  { %p951_p7 = scmp.ne.s32.totalorder %s1490_s5, %s950_s9  ;;  %p954_p8 = scmp.lt.u32.totalorder %s950_s9, %s1490_s5 }
 0x693   :  { %p956_p9 = pnand %p954_p8, %p951_p7 }
 0x695   :  { %959 = shalt.err (!%p956_p9)
}
 0x696   :  { %793 = dma.vmem_to_hbm [thread:$0]  %s788_s30, 512, %s1490_s5, [#allocation6], %s967_s28, %s967_s28, %s968_s29  }
 0x697   :  { %964 = dma.done.wait [#allocation6], 512  }
 0x698   :  { %965 = vsyncadd [#allocation6], 4294966784 }
 0x699   :  { %797 = vsyncpa [#allocation5], 1 }
 0x69a   :  { %798 = vsyncpa [#allocation8], 1 }
 0x69b   :  { %799 = vsyncpa [#allocation6], 1 }

</bundles_post_ra>
